<compile_context>
chip_gen: v6e
topology: v6e:2x2x1
jax: 0.10.0
libtpu: 0.0.40
codegen_flags: <defaults>
</compile_context>

<pallas_src>
import functools

import jax
import jax.numpy as jnp
from jax.experimental import pallas as pl
from jax.experimental.pallas import tpu as pltpu


def _focal_kernel(alpha_sref, x_ref, t_ref, out_ref, *,
                  class_num, gamma, acc_rows, rows_last, has_ragged_j):
    j = pl.program_id(1)
    nj = pl.num_programs(1)

    # Per-batch-row partial sum lives in the resident output block.
    @pl.when(j == 0)
    def _():
        out_ref[...] = jnp.zeros_like(out_ref)

    t = t_ref[0, 0].astype(jnp.int32)                  # (r_tile, 128) class ids

    # Small-class-count gather: C-1 selects per lane, seeded from class 0
    # (saves two selects + two zero-vreg materializations per output vreg).
    probs = x_ref[0, 0].astype(jnp.float32)
    a_sel = jnp.full(t.shape, alpha_sref[0], jnp.float32)
    for c in range(1, class_num):
        hit = t == c
        probs = jnp.where(hit, x_ref[0, c].astype(jnp.float32), probs)
        a_sel = jnp.where(hit, alpha_sref[c], a_sel)   # scalar alpha from SMEM

    probs = probs + 1e-10
    log_probs = jnp.log(probs)
    if gamma > 0:
        # gamma stays a compile-time Python number; int gamma lowers to muls.
        loss = -a_sel * (1.0 - probs) ** gamma * log_probs
    else:
        loss = -a_sel * log_probs

    def _accumulate(l):
        if l.shape[0] != acc_rows:
            # Tree-reduce the (r_tile, 128) tile to one (8, 128) vreg so the
            # accumulator touch is a single vector load + store per step.
            l = l.reshape(-1, acc_rows, 128).sum(axis=0)
        out_ref[...] += l[None]

    if has_ragged_j:
        # Only the final (partial) row-block pays for the mask.
        @pl.when(j == nj - 1)
        def _():
            row = jax.lax.broadcasted_iota(jnp.int32, loss.shape, 0)
            _accumulate(jnp.where(row < rows_last, loss, 0.0))

        @pl.when(j != nj - 1)
        def _():
            _accumulate(loss)
    else:
        _accumulate(loss)


def _sublane_multiple(dtype):
    # (8, 128) tiles for 32-bit dtypes; sub-32-bit dtypes pack along sublanes.
    return max(8, 32 // dtype.itemsize)


def _vmem_budgets():
    """(x-block byte budget, scoped-VMEM limit) sized per TPU generation."""
    try:
        cap = getattr(pltpu.get_tpu_info(), "vmem_capacity_bytes", None)
    except Exception:  # pragma: no cover - conservative fallback
        cap = None
    if cap is not None and cap >= 96 * 1024 * 1024:
        # v5e / v6e: 128 MiB VMEM -> large blocks, high scoped limit.
        return 16 * 1024 * 1024, 100 * 1024 * 1024
    # v7x (64 MiB VMEM) or unknown: 2x(x + t) double buffers stay well inside.
    return 8 * 1024 * 1024, 48 * 1024 * 1024


def focal_loss(inputs, target, *, class_num, alpha=None, gamma=2,
               size_average=True, target_block_bytes=None):
    """Pallas FocalLoss forward (matches the PyTorch module's math).

    inputs: NCHW [B, C, H, W], NCDHW [B, C, D, H, W] or flat [N, C]
            probabilities, float32 or bfloat16.
    target: integer class ids, one per sample (int8/int16/int32 accepted
            as-is; other dtypes are cast to int32).
    """
    if alpha is None:
        alpha_vec = jnp.full((class_num,), 1.0 / class_num, jnp.float32)
    else:
        alpha_vec = jnp.asarray(alpha, jnp.float32).reshape(-1)
        alpha_vec = alpha_vec / alpha_vec.sum()

    # Keep narrow caller dtypes (bf16 probs, int8/int16 targets) to cut HBM
    # bytes/sample; never insert an extra wrapper-side cast pass for them.
    if inputs.dtype not in (jnp.float32, jnp.bfloat16):
        inputs = inputs.astype(jnp.float32)
    if target.dtype not in (jnp.int8, jnp.int16, jnp.int32, jnp.uint8):
        target = target.astype(jnp.int32)

    # TODO(synk): biggest remaining lever is accepting logits and fusing the
    # per-class softmax into this kernel (all C class values are resident in
    # the tile; the exps would ride the otherwise-idle EUP slot).

    if inputs.ndim in (4, 5):
        # Consume NCHW/NCDHW directly: pure reshape, no transpose copy in HBM.
        b_dim = inputs.shape[0]
        assert inputs.shape[1] == class_num
        x = inputs.reshape(b_dim, class_num, -1)            # (B, C, S)
        t = target.reshape(b_dim, 1, -1)                    # (B, 1, S)
    else:
        assert inputs.ndim == 2 and inputs.shape[1] == class_num
        # TODO(synk): the flat [N, C] path still pays one HBM transpose before
        # the kernel; fold it into the kernel if this path ever becomes hot.
        b_dim = 1
        x = inputs.T.reshape(1, class_num, -1)
        t = target.reshape(1, 1, -1)

    s = x.shape[-1]                      # samples per batch row
    total_n = b_dim * s

    # Pad ONLY to the next multiple of 128 (needed for the (..., 128) view).
    # x is padded with 1.0 so padded lanes contribute exactly-zero loss; the
    # target pad value 0 is a valid class id, so the select chain stays safe.
    cols128 = -(-s // 128)
    s128 = cols128 * 128
    if s128 != s:
        x = jnp.pad(x, ((0, 0), (0, 0), (0, s128 - s)), constant_values=1.0)
        t = jnp.pad(t, ((0, 0), (0, 0), (0, s128 - s)))
    x4 = x.reshape(b_dim, class_num, cols128, 128)
    t4 = t.reshape(b_dim, 1, cols128, 128)

    # Row-block sizing: biggest tile within the per-generation VMEM budget,
    # rounded to the sublane-tiling multiple of the narrowest operand dtype.
    block_budget, vmem_limit = _vmem_budgets()
    if target_block_bytes is not None:
        block_budget = target_block_bytes
    x_itemsize = x4.dtype.itemsize
    rows_mult = max(_sublane_multiple(x4.dtype), _sublane_multiple(t4.dtype))
    rows_budget = max(rows_mult, block_budget // (class_num * 128 * x_itemsize))
    rows_budget = (rows_budget // rows_mult) * rows_mult
    if rows_budget >= cols128:
        r_tile = cols128             # one row-block per batch row (full dim)
    else:
        r_tile = rows_budget
    grid_j = -(-cols128 // r_tile)
    has_ragged_j = (cols128 % r_tile) != 0
    rows_last = cols128 - (grid_j - 1) * r_tile
    acc_rows = 8 if (r_tile % 8 == 0 and r_tile >= 8) else r_tile

    kernel = functools.partial(
        _focal_kernel, class_num=class_num, gamma=gamma,
        acc_rows=acc_rows, rows_last=rows_last, has_ragged_j=has_ragged_j)

    partials = pl.pallas_call(
        kernel,
        out_shape=jax.ShapeDtypeStruct((b_dim, acc_rows, 128), jnp.float32),
        grid_spec=pltpu.PrefetchScalarGridSpec(
            num_scalar_prefetch=1,          # alpha lives in SMEM
            grid=(b_dim, grid_j),
            in_specs=[
                pl.BlockSpec((1, class_num, r_tile, 128),
                             lambda b, j, a: (b, 0, j, 0)),
                pl.BlockSpec((1, 1, r_tile, 128),
                             lambda b, j, a: (b, 0, j, 0)),
            ],
            # Same block across j -> resident accumulator; one block per batch
            # row so the "parallel" batch axis can split across TensorCores
            # (v7x megacore) with independent partial sums.
            out_specs=pl.BlockSpec((1, acc_rows, 128),
                                   lambda b, j, a: (b, 0, 0)),
        ),
        compiler_params=pltpu.CompilerParams(
            dimension_semantics=("parallel", "arbitrary"),
            vmem_limit_bytes=vmem_limit),
    )(alpha_vec, x4, t4)

    total = jnp.sum(partials)               # a handful of tiny partial tiles
    if size_average:
        return total / jnp.float32(total_n)
    return total


def focal_loss_ref(inputs, target, *, class_num, alpha=None, gamma=2,
                   size_average=True):
    """Pure-JAX reference mirroring the PyTorch forward."""
    if alpha is None:
        alpha_vec = jnp.ones((class_num, 1), jnp.float32) / class_num
    else:
        alpha_vec = jnp.asarray(alpha, jnp.float32).reshape(-1, 1)
        alpha_vec = alpha_vec / alpha_vec.sum()
    if inputs.ndim == 4:
        inputs = jnp.transpose(inputs, (0, 2, 3, 1)).reshape(-1, class_num)
    elif inputs.ndim == 5:
        inputs = jnp.transpose(inputs, (0, 2, 3, 4, 1)).reshape(-1, class_num)
    inputs = inputs.astype(jnp.float32)
    target = target.reshape(-1).astype(jnp.int32)
    mask = jnp.eye(class_num, dtype=jnp.float32)[target]
    a = alpha_vec[target]
    probs = (inputs * mask).sum(1).reshape(-1, 1) + 1e-10
    logp = jnp.log(probs)
    if gamma > 0:
        bl = -a * (1.0 - probs) ** gamma * logp
    else:
        bl = -a * logp
    return bl.mean() if size_average else bl.sum()


if __name__ == "__main__":
    B, C, H, W = 2, 4, 16, 16          # N = B*H*W = 512 samples
    key = jax.random.PRNGKey(0)
    kx, kt = jax.random.split(key)
    logits = jax.random.normal(kx, (B, C, H, W), jnp.float32)
    # the PyTorch module expects probabilities on the channel axis
    probs = jax.nn.softmax(logits, axis=1)
    target = jax.random.randint(kt, (B, H, W), 0, C, jnp.int32)

    out = focal_loss(probs, target, class_num=C, gamma=2, size_average=True)
    out = jax.block_until_ready(out)

    ref = focal_loss_ref(probs, target, class_num=C, gamma=2,
                         size_average=True)
    assert jnp.allclose(out, ref, rtol=1e-5, atol=1e-6), (out, ref)

    print("KERNEL_OK")
</pallas_src>

<mosaic_0001>
module attributes {stable_mosaic.version = 11 : i64} {
  func.func @_focal_kernel(%arg0: i32, %arg1: i32, %arg2: memref<4xf32, #tpu.memory_space<smem>>, %arg3: memref<1x4x2x128xf32, #tpu.memory_space<vmem>>, %arg4: memref<1x1x2x128xi32, #tpu.memory_space<vmem>>, %arg5: memref<1x2x128xf32, #tpu.memory_space<vmem>>) attributes {dimension_semantics = [#tpu.dimension_semantics<parallel>, #tpu.dimension_semantics<arbitrary>], iteration_bounds = array<i64: 2, 1>, scalar_prefetch = 1 : i64, scratch_operands = 0 : i64, tpu.core_type = #tpu.core_type<tc>, window_params = [{transform_indices = @transform_0, window_bounds = array<i64: 1, 4, 2, 128>}, {transform_indices = @transform_1, window_bounds = array<i64: 1, 1, 2, 128>}, {transform_indices = @transform_2, window_bounds = array<i64: 1, 2, 128>}]} {
    %c0_i32 = arith.constant 0 : i32
    %0 = arith.cmpi eq, %arg1, %c0_i32 : i32
    %1 = arith.extui %0 : i1 to i32
    %c0_i32_0 = arith.constant 0 : i32
    %2 = arith.cmpi ne, %1, %c0_i32_0 : i32
    scf.if %2 {
      %cst_29 = arith.constant 0.000000e+00 : f32
      %47 = vector.broadcast %cst_29 : f32 to vector<1x2x128xf32>
      %c0_30 = arith.constant 0 : index
      %c0_31 = arith.constant 0 : index
      %c0_32 = arith.constant 0 : index
      %48 = vector.load %arg5[%c0_30, %c0_31, %c0_32] : memref<1x2x128xf32, #tpu.memory_space<vmem>>, vector<1x2x128xf32>
      tpu.vector_store %arg5[%c0_30, %c0_31, %c0_32], %47 {strides = array<i32>} : memref<1x2x128xf32, #tpu.memory_space<vmem>>, vector<1x2x128xf32>,
    } else {
    }
    %c0 = arith.constant 0 : index
    %c0_1 = arith.constant 0 : index
    %c0_2 = arith.constant 0 : index
    %c0_3 = arith.constant 0 : index
    %3 = vector.load %arg4[%c0, %c0_1, %c0_2, %c0_3] : memref<1x1x2x128xi32, #tpu.memory_space<vmem>>, vector<1x1x2x128xi32>
    %4 = vector.shape_cast %3 : vector<1x1x2x128xi32> to vector<2x128xi32>
    %c0_4 = arith.constant 0 : index
    %c0_5 = arith.constant 0 : index
    %c0_6 = arith.constant 0 : index
    %c0_7 = arith.constant 0 : index
    %5 = vector.load %arg3[%c0_4, %c0_5, %c0_6, %c0_7] : memref<1x4x2x128xf32, #tpu.memory_space<vmem>>, vector<1x1x2x128xf32>
    %6 = vector.shape_cast %5 : vector<1x1x2x128xf32> to vector<2x128xf32>
    %c0_8 = arith.constant 0 : index
    %7 = memref.load %arg2[%c0_8] : memref<4xf32, #tpu.memory_space<smem>>
    %8 = vector.broadcast %7 : f32 to vector<2x128xf32>
    %c1_i32 = arith.constant 1 : i32
    %9 = vector.broadcast %c1_i32 : i32 to vector<2x128xi32>
    %10 = arith.cmpi eq, %4, %9 : vector<2x128xi32>
    %c0_9 = arith.constant 0 : index
    %c1 = arith.constant 1 : index
    %c0_10 = arith.constant 0 : index
    %c0_11 = arith.constant 0 : index
    %11 = vector.load %arg3[%c0_9, %c1, %c0_10, %c0_11] : memref<1x4x2x128xf32, #tpu.memory_space<vmem>>, vector<1x1x2x128xf32>
    %12 = vector.shape_cast %11 : vector<1x1x2x128xf32> to vector<2x128xf32>
    %13 = arith.select %10, %12, %6 : vector<2x128xi1>, vector<2x128xf32>
    %c1_12 = arith.constant 1 : index
    %14 = memref.load %arg2[%c1_12] : memref<4xf32, #tpu.memory_space<smem>>
    %15 = vector.broadcast %14 : f32 to vector<2x128xf32>
    %16 = arith.select %10, %15, %8 : vector<2x128xi1>, vector<2x128xf32>
    %c2_i32 = arith.constant 2 : i32
    %17 = vector.broadcast %c2_i32 : i32 to vector<2x128xi32>
    %18 = arith.cmpi eq, %4, %17 : vector<2x128xi32>
    %c0_13 = arith.constant 0 : index
    %c2 = arith.constant 2 : index
    %c0_14 = arith.constant 0 : index
    %c0_15 = arith.constant 0 : index
    %19 = vector.load %arg3[%c0_13, %c2, %c0_14, %c0_15] : memref<1x4x2x128xf32, #tpu.memory_space<vmem>>, vector<1x1x2x128xf32>
    %20 = vector.shape_cast %19 : vector<1x1x2x128xf32> to vector<2x128xf32>
    %21 = arith.select %18, %20, %13 : vector<2x128xi1>, vector<2x128xf32>
    %c2_16 = arith.constant 2 : index
    %22 = memref.load %arg2[%c2_16] : memref<4xf32, #tpu.memory_space<smem>>
    %23 = vector.broadcast %22 : f32 to vector<2x128xf32>
    %24 = arith.select %18, %23, %16 : vector<2x128xi1>, vector<2x128xf32>
    %c3_i32 = arith.constant 3 : i32
    %25 = vector.broadcast %c3_i32 : i32 to vector<2x128xi32>
    %26 = arith.cmpi eq, %4, %25 : vector<2x128xi32>
    %c0_17 = arith.constant 0 : index
    %c3 = arith.constant 3 : index
    %c0_18 = arith.constant 0 : index
    %c0_19 = arith.constant 0 : index
    %27 = vector.load %arg3[%c0_17, %c3, %c0_18, %c0_19] : memref<1x4x2x128xf32, #tpu.memory_space<vmem>>, vector<1x1x2x128xf32>
    %28 = vector.shape_cast %27 : vector<1x1x2x128xf32> to vector<2x128xf32>
    %29 = arith.select %26, %28, %21 : vector<2x128xi1>, vector<2x128xf32>
    %c3_20 = arith.constant 3 : index
    %30 = memref.load %arg2[%c3_20] : memref<4xf32, #tpu.memory_space<smem>>
    %31 = vector.broadcast %30 : f32 to vector<2x128xf32>
    %32 = arith.select %26, %31, %24 : vector<2x128xi1>, vector<2x128xf32>
    %cst = arith.constant 1.000000e-10 : f32
    %33 = vector.broadcast %cst : f32 to vector<2x128xf32>
    %34 = arith.addf %29, %33 : vector<2x128xf32>
    %35 = math.log %34 : vector<2x128xf32>
    %cst_21 = arith.constant 0.000000e+00 : f32
    %36 = vector.broadcast %cst_21 : f32 to vector<2x128xf32>
    %37 = arith.subf %36, %32 : vector<2x128xf32>
    %cst_22 = arith.constant 1.000000e+00 : f32
    %38 = vector.broadcast %cst_22 : f32 to vector<2x128xf32>
    %39 = arith.subf %38, %34 : vector<2x128xf32>
    %40 = arith.mulf %39, %39 : vector<2x128xf32>
    %41 = arith.mulf %37, %40 : vector<2x128xf32>
    %42 = arith.mulf %41, %35 : vector<2x128xf32>
    %c0_23 = arith.constant 0 : index
    %c0_24 = arith.constant 0 : index
    %c0_25 = arith.constant 0 : index
    %43 = vector.load %arg5[%c0_23, %c0_24, %c0_25] : memref<1x2x128xf32, #tpu.memory_space<vmem>>, vector<1x2x128xf32>
    %44 = vector.shape_cast %42 : vector<2x128xf32> to vector<1x2x128xf32>
    %45 = arith.addf %43, %44 : vector<1x2x128xf32>
    %c0_26 = arith.constant 0 : index
    %c0_27 = arith.constant 0 : index
    %c0_28 = arith.constant 0 : index
    %46 = vector.load %arg5[%c0_26, %c0_27, %c0_28] : memref<1x2x128xf32, #tpu.memory_space<vmem>>, vector<1x2x128xf32>
    tpu.vector_store %arg5[%c0_26, %c0_27, %c0_28], %45 {strides = array<i32>} : memref<1x2x128xf32, #tpu.memory_space<vmem>>, vector<1x2x128xf32>,
    return
  }
  func.func @transform_0(%arg0: i32, %arg1: i32, %arg2: memref<4xf32, #tpu.memory_space<smem>>) -> (i32, i32, i32, i32) {
    %c0_i32 = arith.constant 0 : i32
    %c0_i32_0 = arith.constant 0 : i32
    %c0_i32_1 = arith.constant 0 : i32
    return %arg0, %c0_i32, %arg1, %c0_i32_0 : i32, i32, i32, i32
  }
  func.func @transform_1(%arg0: i32, %arg1: i32, %arg2: memref<4xf32, #tpu.memory_space<smem>>) -> (i32, i32, i32, i32) {
    %c0_i32 = arith.constant 0 : i32
    %c0_i32_0 = arith.constant 0 : i32
    %c0_i32_1 = arith.constant 0 : i32
    return %arg0, %c0_i32, %arg1, %c0_i32_0 : i32, i32, i32, i32
  }
  func.func @transform_2(%arg0: i32, %arg1: i32, %arg2: memref<4xf32, #tpu.memory_space<smem>>) -> (i32, i32, i32) {
    %c0_i32 = arith.constant 0 : i32
    %c0_i32_0 = arith.constant 0 : i32
    %c0_i32_1 = arith.constant 0 : i32
    return %arg0, %c0_i32, %c0_i32_0 : i32, i32, i32
  }
}

</mosaic_0001>

<bundles_post_ra>
// kernel: tpu_custom_call.1
= control target key start
LH: loop header
LB: loop body
LE: loop exit
PB: predicated region body
PF: predicated region fallthrough
CT: control target
= control target key end

     0   :  { %s630_s12 = smov [#allocation3]   ;;  %s828_s0 = inlined_call_operand.hbm [shape: f32[4], index: 0, kind: input, shape index: {}]   ;;  %s829_s1 = inlined_call_operand.hbm [shape: f32[2,4,2,128], index: 1, kind: input, shape index: {}]   ;;  %s830_s2 = inlined_call_operand.hbm [shape: s32[2,1,2,128], index: 2, kind: input, shape index: {}]   ;;  %s831_s3 = inlined_call_operand.hbm [shape: f32[2,2,128], index: 3, kind: output, shape index: {}]  }
   0x1   :  { %9 = dma.hbm_to_smem %s828_s0, 16, %s630_s12, [#allocation2] }
   0x2   :  { %592 = dma.done.wait [#allocation2], 16 }
   0x3   :  { %593 = vsyncadd [#allocation2], 4294967280 }
   0x4   :  { %11 = sfence }
   0x5   :  { %12 = vsyncpa [#allocation5], 0 }
   0x6   :  { %14 = vsyncpa [#allocation5 + $0x1], 0 }
   0x7   :  { %15 = vsyncpa [#allocation8], 0 }
   0x8   :  { %17 = vsyncpa [#allocation8 + $0x1], 0 }
   0x9   :  { %18 = vsyncpa [#allocation6], 0 }
   0xa   :  { %20 = vsyncpa [#allocation6 + $0x1], 0  ;;  %s660_s15 = smov 0   ;;  %s662_s16 = smov 0  }
   0xb   :  { %s664_s17 = smov 0   ;;  %s666_s18 = smov 0  }
   0xc   :  { %s668_s19 = smov 0   ;;  %s670_s0 = smov 0  }
   0xd LB: > { %s381_s20 = sadd.s32 4294967295, %s628_s0   ;;  %s382_s21 = sadd.s32 4294967294, %s628_s0   ;;  %s628_s0 = sphi %s670_s0, %s26_s0   ;;  %s624_s19 = sphi %s668_s19, %s843_s19   ;;  %s620_s18 = sphi %s666_s18, %s842_s18   ;;  %s616_s17 = sphi %s664_s17, %s841_s17   ;;  %s612_s16 = sphi %s662_s16, %s840_s16   ;;  %s608_s15 = sphi %s660_s15, %s839_s15  }
   0xe   : > { %s38_s22 = sadd.s32 1, %s624_s19  ;;  %s47_s23 = sadd.s32 1, %s616_s17 }
   0xf   : > { %p40_p0 = scmp.ge.s32.totalorder %s38_s22, 2  ;;  %p54_p1 = scmp.ne.s32.totalorder %s616_s17, %s612_s16 }
  0x10   : > { %p55_p2 = scmp.eq.s32.totalorder %s628_s0, 0  ;;  %p60_p3 = scmp.ne.s32.totalorder %s612_s16, %s608_s15 }
  0x11   : > { %s845_s22 = smov (%p40_p0, %s38_s22), 0  ;;  %p61_p5 = scmp.eq.s32.totalorder %s381_s20, 0 }
  0x12   : > { %p701_p4 = por %p55_p2, %p54_p1  ;;  %s42_s25 = ssub.s32 %s624_s19, %s845_s22 }
  0x13   : > { %p112_p6 = scmp.eq.s32.totalorder %s381_s20, 1  ;;  %p45_p7 = scmp.eq.s32.totalorder %s42_s25, 0 }
  0x14   : > { %p707_p8 = por %p61_p5, %p60_p3  ;;  %p118_p10 = scmp.eq.s32.totalorder %s382_s21, 1 }
  0x15   : > { %p711_p9 = por %p112_p6, %p54_p1  ;;  %p422_p13 = scmp.lt.s32.totalorder %s628_s0, 2 }
  0x16   : > { %s716_s28 = scalar_select %p45_p7, %s616_s17, %s47_s23  }
  0x17   : > { %p718_p11 = por %p118_p10, %p60_p3  ;;  %s725_s30 = sand.u32 1, %s616_s17  }
  0x18   : > { %s385_s4 = sshll.u32 %s725_s30, 3  ;;  %s404_s5 = sshll.u32 %s624_s19, 7 }
  0x19   : > { %s149_s8 = scalar_lea.hbm %s829_s1, %s404_s5  ;;  %s142_s9 = scalar_lea.vmem [#allocation4], %s385_s4 }
  0x1a   : > { %s150_s10 = sshll.u32 %s142_s9, 4  ;;  %p734_p0 = pnand %p422_p13, %p701_p4  ;;  %s151_s10 = int_to_ptr.vmem [resolvable:$true] %s150_s10 }
  0x1b   : > { %p390_p1 = scmp.ge.s32.totalorder %s628_s0, 1  ;;  %s139_s12 = scalar_lea.sflag [#allocation5], %s725_s30 }
  0x1c   : > { %p488_p2 = pneg %p734_p0  ;;  %s499_s13 = scalar_lea.vmem %s151_s10, 128 }
  0x1d   : > { %p500_p3 = scmp.ne.s32.totalorder %s151_s10, %s499_s13  ;;  %s631_s14 = smov [#allocation4]  }
  0x1e   : > { %s504_s20 = sshll.u32 %s631_s14, 4  ;;  %s505_s20 = int_to_ptr.vmem [resolvable:$false] %s504_s20 }
  0x1f   : > { %p502_p5 = pnand %p500_p3, %p488_p2  ;;  %s506_s21 = scalar_lea.vmem %s505_s20, 256 }
  0x20   : > { %p507_p4 = scmp.lt.s32.totalorder %s151_s10, %s505_s20  ;;  %p508_p7 = scmp.lt.s32.totalorder %s506_s21, %s499_s13 }
  0x21   : > { %p503_p6 = pneg %p502_p5 }
  0x22   : > { %p509_p10 = por %p508_p7, %p507_p4 }
  0x24   : > { %p510_p13 = pnand %p509_p10, %p503_p6 }
  0x26   : > { %513 = shalt.err (!%p510_p13)
}
  0x27   : > { %s632_s23 = smov 32   ;;  %s633_s24 = smov 2  }
  0x28   : > { %414 = dma.hbm_to_vmem [thread:$0]  (!%p734_p0), %s149_s8, 128, %s151_s10, %s139_s12, %s632_s23, %s632_s23, %s633_s24  }
  0x29   : > { %p177_p3 = scmp.lt.s32.totalorder %s628_s0, 3  ;;  %s388_s25 = sshll.u32 %s725_s30, 1 }
  0x2a   : > { %s389_s4 = sshll.u32 %s624_s19, 5  ;;  %s164_s13 = scalar_lea.vmem [#allocation7], %s388_s25 }
  0x2b   : > { %p752_p5 = pnand %p390_p1, %p177_p3  ;;  %s170_s9 = scalar_lea.hbm %s830_s2, %s389_s4 }
  0x2c   : > { %s172_s14 = sshll.u32 %s164_s13, 4  ;;  %s161_s20 = scalar_lea.sflag [#allocation8], %s725_s30  ;;  %s173_s14 = int_to_ptr.vmem [resolvable:$true] %s172_s14 }
  0x2d   : > { %s527_s21 = scalar_lea.vmem %s173_s14, 32  ;;  %s634_s8 = smov [#allocation7]  }
  0x2e   : > { %p528_p6 = scmp.ne.s32.totalorder %s173_s14, %s527_s21  ;;  %s532_s10 = sshll.u32 %s634_s8, 4  ;;  %s533_s10 = int_to_ptr.vmem [resolvable:$false] %s532_s10 }
  0x2f   : > { %s534_s12 = scalar_lea.vmem %s533_s10, 64  ;;  %p535_p1 = scmp.lt.s32.totalorder %s173_s14, %s533_s10 }
  0x30   : > { %p530_p4 = pnand %p528_p6, %p488_p2  ;;  %p536_p10 = scmp.lt.s32.totalorder %s534_s12, %s527_s21 }
  0x32   : > { %p531_p7 = pneg %p530_p4  ;;  %p537_p13 = por %p536_p10, %p535_p1 }
  0x34   : > { %p538_p3 = pnand %p537_p13, %p531_p7 }
  0x36   : > { %541 = shalt.err (!%p538_p3)
}
  0x37   : > { %417 = dma.hbm_to_vmem [thread:$0]  (!%p734_p0), %s170_s9, 32, %s173_s14, %s161_s20  }
  0x38   : > { %181 = sbr.rel (%p752_p5) target bundleno = 106 (0x6a), region = 28  ;;  %s768_s30 = sand.u32 (!%p752_p5), 1, %s612_s16  }
  0x39   : > { %s391_s23 = sshll.u32 (!%p752_p5), %s768_s30, 3  ;;  %s184_s24 = scalar_lea.sflag (!%p752_p5), [#allocation5], %s768_s30 }
  0x3a   : > { %s187_s25 = scalar_lea.vmem (!%p752_p5), [#allocation4], %s391_s23 }
  0x3d   : > { %595 = dma.done.wait (%p707_p8), %s184_s24, 128  }
  0x3e   : > { %597 = vsyncadd (%p707_p8), %s184_s24, 4294967168  ;;  %s392_s11 = sshll.u32 %s768_s30, 1  ;;  %s193_s4 = scalar_lea.sflag [#allocation8], %s768_s30 }
  0x3f   : > { %s196_s5 = scalar_lea.vmem [#allocation7], %s392_s11 }
  0x40   : > { %599 = dma.done.wait (%p707_p8), %s193_s4, 32  }
  0x41   : > { %601 = vsyncadd (%p707_p8), %s193_s4, 4294967264  ;;  %s782_s6 = scalar_lea.vmem [#allocation9], %s392_s11  ;;  %v635_v0 = vmov 0.0   ;;  %s229_s7 = sld [smem:[#allocation3]]  ;;  %v227_v1 = vld [vmem:[%s196_s5] sm:$0x3] }
  0x42   : > { %226 = vst [vmem:[%s782_s6] sm:$0x3] %v635_v0  ;;  %s395_s9 = sld [smem:[#allocation3 + $0x1]]  ;;  %v228_v2 = vld [vmem:[%s187_s25] sm:$0x3]  ;;  %v394_v3 = vld [vmem:[%s187_s25 + $0x2] sm:$0x3] }
  0x43   : > { %s397_s13 = sld [smem:[#allocation3 + $0x2]]  ;;  %vm231_vm0 = vcmp.eq.s32.totalorder %v227_v1, 1  ;;  %vm238_vm1 = vcmp.eq.s32.totalorder %v227_v1, 2  ;;  %v396_v4 = vld [vmem:[%s187_s25 + $0x4] sm:$0x3]  ;;  %vm245_vm2 = vcmp.eq.s32.totalorder %v227_v1, 3 }
  0x44   : > { %s399_s14 = sld [smem:[#allocation3 + $0x3]]  ;;  %v234_v5 = vsel %vm231_vm0, %v394_v3, %v228_v2  ;;  %v398_v6 = vld [vmem:[%s187_s25 + $0x6] sm:$0x3]  ;;  %s401_s26 = sshll.u32 %s620_s18, 5 }
  0x45   : > { %v241_v9 = vsel %vm238_vm1, %v396_v4, %v234_v5  ;;  %s277_s20 = sshll.u32 %s782_s6, 4  ;;  %s275_s10 = scalar_lea.hbm %s831_s3, %s401_s26  ;;  %s278_s20 = int_to_ptr.vmem [resolvable:$true] %s277_s20 }
  0x46   : > { %v248_v10 = vsel %vm245_vm2, %v398_v6, %v241_v9  ;;  %s264_s12 = scalar_lea.sflag [#allocation6], %s768_s30  ;;  %s542_s23 = scalar_lea.vmem %s278_s20, 32 }
  0x47   : > { %v230_v7 = vstv %s229_s7  ;;  %v252_v11 = vadd.f32 1e-10, %v248_v10  ;;  %p543_p8 = scmp.ne.s32.totalorder %s278_s20, %s542_s23  ;;  %s636_s24 = smov [#allocation9]  }
  0x48   : > { %v236_v8 = vstv %s395_s9  ;;  %s546_s25 = sshll.u32 %s636_s24, 4  ;;  %s547_s25 = int_to_ptr.vmem [resolvable:$false] %s546_s25 }
  0x49   : > { %v237_v12 = vsel %vm231_vm0, %v236_v8, %v230_v7  ;;  %v243_v13 = vstv %s397_s13  ;;  %476 = vlog2.f32 %v252_v11  ;;  %v256_v16 = vsub.f32 1.0, %v252_v11  ;;  %v260_v23 = vld [vmem:[%s782_s6] sm:$0x3]  ;;  %p544_p0 = pnand %p543_p8, %p711_p9  ;;  %s548_s11 = scalar_lea.vmem %s547_s25, 64 }
  0x4a   : > { %v244_v14 = vsel %vm238_vm1, %v243_v13, %v237_v12  ;;  %v250_v15 = vstv %s399_s14  ;;  %p549_p5 = scmp.lt.s32.totalorder %s278_s20, %s547_s25  ;;  %p550_p6 = scmp.lt.s32.totalorder %s548_s11, %s542_s23 }
  0x4b   : > { %v251_v17 = vsel %vm245_vm2, %v250_v15, %v244_v14  ;;  %v257_v19 = vmul.f32 %v256_v16, %v256_v16  ;;  %p545_p2 = pneg %p544_p0 }
  0x4c   : > { %v255_v18 = vsub.f32 0.0, %v251_v17  ;;  %p551_p4 = por %p550_p6, %p549_p5 }
  0x4e   : > { %v258_v20 = vmul.f32 %v257_v19, %v255_v18  ;;  %p552_p7 = pnand %p551_p4, %p545_p2 }
  0x56   : > { %v477_v21 = vpop.eup %476 }
  0x57   : > { %v254_v22 = vmul.f32 0.6931472, %v477_v21 }
  0x59   : > { %v259_v24 = vmul.f32 %v258_v20, %v254_v22 }
  0x5b   : > { %v261_v25 = vadd.f32 %v260_v23, %v259_v24 }
  0x5d   : > { %262 = vst [vmem:[%s782_s6] sm:$0x3] %v261_v25 }
  0x5e   : > { %555 = shalt.err (!%p552_p7)
}
  0x5f   : > { %s556_s18 = scalar_lea.hbm %s275_s10, 32  ;;  %s560_s5 = scalar_lea.hbm %s831_s3, 64 }
  0x60   : > { %p557_p1 = scmp.ne.s32.totalorder %s275_s10, %s556_s18  ;;  %p561_p3 = scmp.lt.s32.totalorder %s275_s10, %s831_s3 }
  0x61   : > { %p562_p8 = scmp.lt.s32.totalorder %s560_s5, %s556_s18 }
  0x62   : > { %p558_p10 = pnand %p557_p1, %p711_p9 }
  0x63   : > { %p563_p0 = por %p562_p8, %p561_p3 }
  0x64   : > { %p559_p13 = pneg %p558_p10 }
  0x66   : > { %p564_p12 = pnand %p563_p0, %p559_p13 }
  0x68   : > { %567 = shalt.err (!%p564_p12)
}
  0x69   : > { %409 = dma.vmem_to_hbm [thread:$0]  (%p711_p9), %s278_s20, 32, %s275_s10, %s264_s12  }
  0x6a PF: > { %s289_s9 = sand.u32 1, %s608_s15   ;;  %p838_p2 = scmp.ge.s32.totalorder %s628_s0, 2 }
  0x6b   : > { %s290_s13 = scalar_lea.sflag [#allocation6], %s289_s9 }
  0x6c   : > { %p419_p5 = pnand %p838_p2, %p718_p11 }
  0x6e   : > { %p420_p6 = pneg %p419_p5 }
  0x70   : > { %603 = dma.done.wait (%p420_p6), %s290_s13, 32  }
  0x71   : > { %605 = vsyncadd (%p420_p6), %s290_s13, 4294967264  ;;  %s26_s0 = sadd.s32 1, %s628_s0   ;;  %s839_s15 = smov %s612_s16 }
  0x72   : > { %p23_p4 = scmp.ge.s32.totalorder %s26_s0, 4   ;;  %s840_s16 = smov %s616_s17 }
  0x73   : > { %s841_s17 = smov %s716_s28  ;;  %s842_s18 = smov %s624_s19 }
  0x74   : > { %s843_s19 = smov %s845_s22  ;;  %25 = sbr.rel (!%p23_p4) target bundleno = 13 (0xd), region = 93 }
  0x79   :  { %295 = vsyncpa [#allocation5], 1 }
  0x7a   :  { %297 = vsyncpa [#allocation5 + $0x1], 1 }
  0x7b   :  { %298 = vsyncpa [#allocation8], 1 }
  0x7c   :  { %300 = vsyncpa [#allocation8 + $0x1], 1 }
  0x7d   :  { %301 = vsyncpa [#allocation6], 1 }
  0x7e   :  { %303 = vsyncpa [#allocation6 + $0x1], 1 }

</bundles_post_ra>
